<compile_context>
chip_gen: v6e
topology: v6e:2x2x1
jax: 0.10.0
libtpu: 0.0.40
codegen_flags: <defaults>
</compile_context>

<pallas_src>
import jax
import jax.numpy as jnp
import numpy as np
from jax.experimental import pallas as pl
from jax.experimental.pallas import tpu as pltpu


def _round_up(x: int, m: int) -> int:
    return ((x + m - 1) // m) * m


def _vmem_capacity_bytes() -> int:
    try:
        return int(pltpu.get_tpu_info().vmem_capacity_bytes)
    except Exception:
        return 64 * 1024 * 1024          # conservative fallback (v7x per-TC VMEM)


def _make_halo_kernel(k, dilation, padding, l_tile, halo_blk, length,
                      compute_dtype):
    """General Conv1d tile kernel (K > 1 and/or padding > 0).

    Refs:
      x_ref  : (1, C_in, L_TILE)     main activation tile  (original dtype)
      xl_ref : (1, C_in, HALO_BLK)   previous-tile halo
      xr_ref : (1, C_in, HALO_BLK)   next-tile halo
      w_ref  : (K, C_out, C_in)      per-tap weights       (compute dtype)
      b_ref  : (C_out, 1)            bias                  (f32)
      o_ref  : (1, C_out, L_TILE)    output tile (last dim % 128 == 0 -> lane-dense)
      win_ref: (C_in, 2*HALO_BLK + L_TILE) window scratch  (compute dtype)
    """

    def kernel(x_ref, xl_ref, xr_ref, w_ref, b_ref, o_ref, win_ref):
        j = pl.program_id(1)
        base = j * l_tile - halo_blk          # input coord of window column 0

        def coords(width, off):
            return (jax.lax.broadcasted_iota(jnp.int32, (1, width), 1)
                    + base + off)

        # Left halo: zero everything mapping to input coords < 0 (conv left
        # padding; also neutralizes the clamped fetch at j == 0) or >= length
        # (neutralizes the clamped fetch on far-right tiles).
        lc = coords(halo_blk, 0)
        win_ref[:, 0:halo_blk] = jnp.where(
            (lc >= 0) & (lc < length), xl_ref[0], 0.0).astype(compute_dtype)

        # Main tile: unmasked fast path when fully interior; masked path only
        # when the tile overlaps the end of the input (ragged tail / clamped
        # fetch must read as conv zero padding).
        tile_hi = (j + 1) * l_tile

        @pl.when(tile_hi <= length)
        def _():
            win_ref[:, halo_blk:halo_blk + l_tile] = (
                x_ref[0].astype(compute_dtype))

        @pl.when(tile_hi > length)
        def _():
            mc = coords(l_tile, halo_blk)
            win_ref[:, halo_blk:halo_blk + l_tile] = jnp.where(
                mc < length, x_ref[0], 0.0).astype(compute_dtype)

        # Right halo (conv right padding / ragged tail / clamped fetch).
        rc = coords(halo_blk, halo_blk + l_tile)
        win_ref[:, halo_blk + l_tile:] = jnp.where(
            rc < length, xr_ref[0], 0.0).astype(compute_dtype)

        # K accumulating MXU contractions, one per tap, sliced straight out of
        # the window scratch (no (K*C_in, L_TILE) im2col stack).  f32
        # accumulation; on v7x the tap accumulation maps onto the MRB.
        off0 = halo_blk - padding
        acc = jnp.dot(w_ref[0], win_ref[:, off0:off0 + l_tile],
                      preferred_element_type=jnp.float32)
        for t in range(1, k):
            off = off0 + t * dilation
            acc = acc + jnp.dot(w_ref[t], win_ref[:, off:off + l_tile],
                                preferred_element_type=jnp.float32)
        o_ref[0] = (acc + b_ref[...]).astype(o_ref.dtype)

    return kernel


def _make_pointwise_kernel(compute_dtype):
    """kernel_size=1, padding=0 (ConvNorm default): one channel-mixing matmul."""

    def kernel(x_ref, w_ref, b_ref, o_ref):
        acc = jnp.dot(w_ref[0], x_ref[0].astype(compute_dtype),
                      preferred_element_type=jnp.float32)
        o_ref[0] = (acc + b_ref[...]).astype(o_ref.dtype)

    return kernel


def spectral_normalize_weight(weight, n_power_iterations=1, eps=1e-12, seed=0):
    """Inference-time nn.utils.spectral_norm reparameterization: W / sigma_max.

    Tiny weight-only preprocessing in plain JAX (runs once); not a Pallas target.
    # TODO(synk): torch keeps the power-iteration vector `u` as a trained buffer;
    # here power iteration is re-run from a fixed seed instead.
    """
    c_out = weight.shape[0]
    w_mat = weight.reshape(c_out, -1).astype(jnp.float32)
    u = jax.random.normal(jax.random.PRNGKey(seed), (c_out,), jnp.float32)
    u = u / (jnp.linalg.norm(u) + eps)
    v = None
    for _ in range(max(1, n_power_iterations)):
        v = w_mat.T @ u
        v = v / (jnp.linalg.norm(v) + eps)
        u = w_mat @ v
        u = u / (jnp.linalg.norm(u) + eps)
    sigma = u @ (w_mat @ v)
    return (weight / sigma).astype(weight.dtype)


def conv_norm_forward(x_ncl, weight, bias=None, *, stride=1, padding=None,
                      dilation=1, compute_dtype=jnp.bfloat16, out_dtype=None,
                      l_tile=None):
    """Conv1d forward matching torch.nn.Conv1d (stride=1) semantics.

    x_ncl  : (N, C_in, L)      PyTorch NCL layout (kernel computes in NCL)
    weight : (C_out, C_in, K)
    bias   : (C_out,) or None
    compute_dtype : dtype fed to the MXU (bf16 default; accumulation is f32)
    out_dtype     : output dtype (default x.dtype; pass bf16 to halve writeback)
    returns: (N, C_out, L_out)
    """
    n, c_in, length = x_ncl.shape
    c_out, c_in_w, k = weight.shape
    assert c_in == c_in_w
    if padding is None:
        assert k % 2 == 1
        padding = int(dilation * (k - 1) / 2)
    # TODO(synk): stride > 1 would need a strided output->input map; the
    # ConvNorm module default (stride=1) is what we implement.
    assert stride == 1, "kernel implements stride=1 (ConvNorm default)"

    l_out = length + 2 * padding - dilation * (k - 1)
    out_dtype = x_ncl.dtype if out_dtype is None else out_dtype

    in_bytes = np.dtype(x_ncl.dtype).itemsize
    cd_bytes = np.dtype(compute_dtype).itemsize
    out_bytes = np.dtype(out_dtype).itemsize

    pointwise = (k == 1 and padding == 0)
    # Halo block must cover both the left (padding) and right ((K-1)d - padding)
    # overhang, rounded to a lane tile.
    halo_blk = _round_up(max(padding, dilation * (k - 1) - padding, 1), 128)
    align = 128 if pointwise else halo_blk

    def vmem_per_step(t):
        # Double-buffered pipeline blocks + in-kernel intermediates (bytes).
        halo_part = 0 if pointwise else (
            4 * c_in * halo_blk * in_bytes                 # 2 halo blocks x 2 bufs
            + c_in * (t + 2 * halo_blk) * cd_bytes)        # window scratch
        return (2 * c_in * t * in_bytes                    # x main block (2 bufs)
                + 2 * c_out * t * out_bytes                # output block (2 bufs)
                + c_out * t * 4                            # f32 accumulator
                + 2 * k * c_out * c_in * cd_bytes          # weights (2 bufs)
                + 2 * c_out * 4                            # bias
                + halo_part)

    vmem_cap = _vmem_capacity_bytes()
    budget = (vmem_cap * 3) // 8          # ~24 MiB on v7x, ~48 MiB on v5e/v6e

    if l_tile is None:
        quant = int(np.lcm(align, 512))   # MXU-friendly multiple of 512
        t = _round_up(min(max(l_out, 1), 8192), quant)
        while t > quant and vmem_per_step(t) > budget:
            t -= quant
        l_tile = t
    else:
        l_tile = _round_up(max(int(l_tile), align), align)

    num_l_tiles = -(-l_out // l_tile)
    l_out_pad = num_l_tiles * l_tile

    # No HBM-side padded copy of the activations; only inputs shorter than one
    # tile get a (tiny) right pad so every BlockSpec block fits in the array.
    x_in = x_ncl
    if length < l_tile:
        x_in = jnp.pad(x_ncl, ((0, 0), (0, 0), (0, l_tile - length)))
    l_x = x_in.shape[2]

    # Per-tap weight layout (K, C_out, C_in); tap t sliced as w_ref[t].
    w3 = jnp.transpose(weight, (2, 0, 1)).astype(compute_dtype)
    if bias is None:
        bias = jnp.zeros((c_out,), jnp.float32)
    b2 = bias.astype(jnp.float32).reshape(c_out, 1)

    n_main = -(-l_x // l_tile)
    est = vmem_per_step(l_tile)
    # Always set the scoped-VMEM limit explicitly (v5e default is only 16 MiB),
    # capped well under physical VMEM on every generation (<= 48 MiB on v7x).
    vmem_limit = int(min((vmem_cap * 3) // 4, max(budget, est) + (16 << 20)))
    cparams = pltpu.CompilerParams(
        dimension_semantics=("parallel", "parallel"),   # megacore over (N, L-tiles)
        vmem_limit_bytes=vmem_limit)
    cost = pl.CostEstimate(
        flops=2 * n * c_out * c_in * k * l_out,
        bytes_accessed=(n * c_in * length * in_bytes
                        + k * c_out * c_in * cd_bytes
                        + n * c_out * l_out * out_bytes),
        transcendentals=0)

    if pointwise:
        kernel = _make_pointwise_kernel(compute_dtype)
        in_specs = [
            pl.BlockSpec((1, c_in, l_tile),
                         lambda b, j: (b, 0, jnp.minimum(j, n_main - 1))),
            pl.BlockSpec((k, c_out, c_in), lambda b, j: (0, 0, 0)),
            pl.BlockSpec((c_out, 1), lambda b, j: (0, 0)),
        ]
        scratch = []
        operands = (x_in, w3, b2)
    else:
        ratio = l_tile // halo_blk
        n_halo = -(-l_x // halo_blk)
        kernel = _make_halo_kernel(k, dilation, padding, l_tile, halo_blk,
                                   length, compute_dtype)
        in_specs = [
            # main activation tile
            pl.BlockSpec((1, c_in, l_tile),
                         lambda b, j: (b, 0, jnp.minimum(j, n_main - 1))),
            # previous-tile halo (clamped at the left edge; masked in-kernel)
            pl.BlockSpec((1, c_in, halo_blk),
                         lambda b, j: (b, 0, jnp.maximum(
                             jnp.minimum(j * ratio - 1, n_halo - 1), 0))),
            # next-tile halo (clamped at the right edge; masked in-kernel)
            pl.BlockSpec((1, c_in, halo_blk),
                         lambda b, j: (b, 0, jnp.minimum((j + 1) * ratio,
                                                         n_halo - 1))),
            pl.BlockSpec((k, c_out, c_in), lambda b, j: (0, 0, 0)),
            pl.BlockSpec((c_out, 1), lambda b, j: (0, 0)),
        ]
        scratch = [pltpu.VMEM((c_in, 2 * halo_blk + l_tile), compute_dtype)]
        operands = (x_in, x_in, x_in, w3, b2)

    out_padded = pl.pallas_call(
        kernel,
        out_shape=jax.ShapeDtypeStruct((n, c_out, l_out_pad), out_dtype),
        grid_spec=pltpu.PrefetchScalarGridSpec(
            num_scalar_prefetch=0,
            grid=(n, num_l_tiles),
            in_specs=in_specs,
            out_specs=pl.BlockSpec((1, c_out, l_tile), lambda b, j: (b, 0, j)),
            scratch_shapes=scratch),
        compiler_params=cparams,
        cost_estimate=cost,
    )(*operands)

    if l_out_pad != l_out:
        out_padded = out_padded[:, :, :l_out]
    return out_padded


if __name__ == "__main__":
    # ConvNorm(in_channels=4, out_channels=8, kernel_size=3) -> padding=1
    in_channels, out_channels, kernel_size = 4, 8, 3
    batch, seq = 2, 16

    key = jax.random.PRNGKey(0)
    kx, kw, kb = jax.random.split(key, 3)
    x = jax.random.normal(kx, (batch, in_channels, seq), dtype=jnp.float32)
    fan_in = in_channels * kernel_size
    bound = 1.0 / (fan_in ** 0.5)
    weight = jax.random.uniform(kw, (out_channels, in_channels, kernel_size),
                                minval=-bound, maxval=bound, dtype=jnp.float32)
    bias = jax.random.uniform(kb, (out_channels,),
                              minval=-bound, maxval=bound, dtype=jnp.float32)

    def ref_conv(xx, ww, bb, pad, dil):
        return jax.lax.conv_general_dilated(
            xx, ww, window_strides=(1,), padding=[(pad, pad)],
            rhs_dilation=(dil,), dimension_numbers=("NCH", "OIH", "NCH"),
        ) + bb[None, :, None]

    # 1) Default path: bf16 MXU inputs, f32 accumulate/epilogue.
    out = jax.block_until_ready(conv_norm_forward(x, weight, bias))
    assert out.shape == (batch, out_channels, seq)
    x_r = x.astype(jnp.bfloat16).astype(jnp.float32)
    w_r = weight.astype(jnp.bfloat16).astype(jnp.float32)
    ref_bf = ref_conv(x_r, w_r, bias, pad=1, dil=1)
    assert jnp.allclose(out, ref_bf, atol=1e-2, rtol=1e-2), "bf16 path mismatch"

    # 2) f32 compute path (tight check against XLA's conv).
    out32 = jax.block_until_ready(
        conv_norm_forward(x, weight, bias, compute_dtype=jnp.float32))
    ref32 = ref_conv(x, weight, bias, pad=1, dil=1)
    assert jnp.allclose(out32, ref32, atol=1e-4, rtol=1e-4), "f32 path mismatch"

    # 3) Dilation + multiple L tiles + ragged tail (halo, masking, clamped maps).
    x2 = jax.random.normal(jax.random.PRNGKey(1), (batch, in_channels, 300),
                           dtype=jnp.float32)
    out3 = jax.block_until_ready(
        conv_norm_forward(x2, weight, bias, dilation=2,
                          compute_dtype=jnp.float32, l_tile=128))
    ref3 = ref_conv(x2, weight, bias, pad=2, dil=2)
    assert out3.shape == ref3.shape
    assert jnp.allclose(out3, ref3, atol=1e-4, rtol=1e-4), "tiled/dilated mismatch"

    # 4) kernel_size=1 (ConvNorm default): pointwise fast path.
    w1 = jax.random.uniform(jax.random.PRNGKey(2),
                            (out_channels, in_channels, 1),
                            minval=-0.5, maxval=0.5, dtype=jnp.float32)
    out4 = jax.block_until_ready(
        conv_norm_forward(x, w1, bias, compute_dtype=jnp.float32))
    ref4 = ref_conv(x, w1, bias, pad=0, dil=1)
    assert jnp.allclose(out4, ref4, atol=1e-4, rtol=1e-4), "pointwise mismatch"

    # 5) spectral_norm=True flavour: weight preprocessing + the same kernel.
    w_sn = spectral_normalize_weight(weight)
    out5 = jax.block_until_ready(
        conv_norm_forward(x, w_sn, bias, compute_dtype=jnp.float32))
    ref5 = ref_conv(x, w_sn, bias, pad=1, dil=1)
    assert jnp.allclose(out5, ref5, atol=1e-4, rtol=1e-4), "spectral-norm mismatch"

    print("KERNEL_OK")
</pallas_src>

<mosaic_0001>
module attributes {stable_mosaic.version = 11 : i64} {
  func.func @kernel(%arg0: i32, %arg1: i32, %arg2: memref<1x4x512xf32, #tpu.memory_space<vmem>>, %arg3: memref<1x4x128xf32, #tpu.memory_space<vmem>>, %arg4: memref<1x4x128xf32, #tpu.memory_space<vmem>>, %arg5: memref<3x8x4xbf16, #tpu.memory_space<vmem>>, %arg6: memref<8x1xf32, #tpu.memory_space<vmem>>, %arg7: memref<1x8x512xf32, #tpu.memory_space<vmem>>, %arg8: memref<4x768xbf16, #tpu.memory_space<vmem>>) attributes {dimension_semantics = [#tpu.dimension_semantics<parallel>, #tpu.dimension_semantics<parallel>], iteration_bounds = array<i64: 2, 1>, scalar_prefetch = 0 : i64, scratch_operands = 1 : i64, tpu.core_type = #tpu.core_type<tc>, window_params = [{transform_indices = @transform_0, window_bounds = array<i64: 1, 4, 512>}, {transform_indices = @transform_1, window_bounds = array<i64: 1, 4, 128>}, {transform_indices = @transform_2, window_bounds = array<i64: 1, 4, 128>}, {pipeline_mode = #tpu.pipeline_mode<synchronous>, transform_indices = @transform_3, window_bounds = array<i64: 3, 8, 4>}, {pipeline_mode = #tpu.pipeline_mode<synchronous>, transform_indices = @transform_4, window_bounds = array<i64: 8, 1>}, {transform_indices = @transform_5, window_bounds = array<i64: 1, 8, 512>}]} {
    %c512_i32 = arith.constant 512 : i32
    %0 = arith.muli %arg1, %c512_i32 : i32
    %c128_i32 = arith.constant 128 : i32
    %1 = arith.subi %0, %c128_i32 : i32
    %2 = tpu.iota {dimensions = array<i32: 1>} : vector<1x128xi32>
    %3 = vector.broadcast %1 : i32 to vector<1x128xi32>
    %4 = arith.addi %2, %3 : vector<1x128xi32>
    %c0_i32 = arith.constant 0 : i32
    %5 = vector.broadcast %c0_i32 : i32 to vector<1x128xi32>
    %6 = arith.addi %4, %5 : vector<1x128xi32>
    %c0_i32_0 = arith.constant 0 : i32
    %7 = vector.broadcast %c0_i32_0 : i32 to vector<1x128xi32>
    %8 = arith.cmpi sge, %6, %7 : vector<1x128xi32>
    %c16_i32 = arith.constant 16 : i32
    %9 = vector.broadcast %c16_i32 : i32 to vector<1x128xi32>
    %10 = arith.cmpi slt, %6, %9 : vector<1x128xi32>
    %11 = arith.andi %8, %10 : vector<1x128xi1>
    %c0 = arith.constant 0 : index
    %c0_1 = arith.constant 0 : index
    %c0_2 = arith.constant 0 : index
    %12 = vector.load %arg3[%c0, %c0_1, %c0_2] : memref<1x4x128xf32, #tpu.memory_space<vmem>>, vector<1x4x128xf32>
    %13 = vector.shape_cast %12 : vector<1x4x128xf32> to vector<4x128xf32>
    %cst = arith.constant 0.000000e+00 : f32
    %14 = vector.shape_cast %11 : vector<1x128xi1> to vector<1x128xi1>
    %15 = vector.broadcast %14 : vector<1x128xi1> to vector<4x128xi1>
    %16 = vector.broadcast %cst : f32 to vector<4x128xf32>
    %17 = arith.select %15, %13, %16 : vector<4x128xi1>, vector<4x128xf32>
    %18 = arith.truncf %17 : vector<4x128xf32> to vector<4x128xbf16>
    %c0_3 = arith.constant 0 : index
    %c0_4 = arith.constant 0 : index
    %19 = vector.load %arg8[%c0_3, %c0_4] : memref<4x768xbf16, #tpu.memory_space<vmem>>, vector<4x128xbf16>
    tpu.vector_store %arg8[%c0_3, %c0_4], %18 {strides = array<i32>} : memref<4x768xbf16, #tpu.memory_space<vmem>>, vector<4x128xbf16>,
    %c1_i32 = arith.constant 1 : i32
    %20 = arith.addi %arg1, %c1_i32 : i32
    %c512_i32_5 = arith.constant 512 : i32
    %21 = arith.muli %20, %c512_i32_5 : i32
    %c16_i32_6 = arith.constant 16 : i32
    %22 = arith.cmpi sle, %21, %c16_i32_6 : i32
    %23 = arith.extui %22 : i1 to i32
    %c0_i32_7 = arith.constant 0 : i32
    %24 = arith.cmpi ne, %23, %c0_i32_7 : i32
    scf.if %24 {
      %c0_34 = arith.constant 0 : index
      %c0_35 = arith.constant 0 : index
      %c0_36 = arith.constant 0 : index
      %63 = vector.load %arg2[%c0_34, %c0_35, %c0_36] : memref<1x4x512xf32, #tpu.memory_space<vmem>>, vector<1x4x512xf32>
      %64 = vector.shape_cast %63 : vector<1x4x512xf32> to vector<4x512xf32>
      %65 = arith.truncf %64 : vector<4x512xf32> to vector<4x512xbf16>
      %c0_37 = arith.constant 0 : index
      %c128_38 = arith.constant 128 : index
      %66 = vector.load %arg8[%c0_37, %c128_38] : memref<4x768xbf16, #tpu.memory_space<vmem>>, vector<4x512xbf16>
      tpu.vector_store %arg8[%c0_37, %c128_38], %65 {strides = array<i32>} : memref<4x768xbf16, #tpu.memory_space<vmem>>, vector<4x512xbf16>,
    } else {
    }
    %c16_i32_8 = arith.constant 16 : i32
    %25 = arith.cmpi sgt, %21, %c16_i32_8 : i32
    %26 = arith.extui %25 : i1 to i32
    %c0_i32_9 = arith.constant 0 : i32
    %27 = arith.cmpi ne, %26, %c0_i32_9 : i32
    scf.if %27 {
      %63 = tpu.iota {dimensions = array<i32: 1>} : vector<1x512xi32>
      %64 = vector.broadcast %1 : i32 to vector<1x512xi32>
      %65 = arith.addi %63, %64 : vector<1x512xi32>
      %c128_i32_34 = arith.constant 128 : i32
      %66 = vector.broadcast %c128_i32_34 : i32 to vector<1x512xi32>
      %67 = arith.addi %65, %66 : vector<1x512xi32>
      %c16_i32_35 = arith.constant 16 : i32
      %68 = vector.broadcast %c16_i32_35 : i32 to vector<1x512xi32>
      %69 = arith.cmpi slt, %67, %68 : vector<1x512xi32>
      %c0_36 = arith.constant 0 : index
      %c0_37 = arith.constant 0 : index
      %c0_38 = arith.constant 0 : index
      %70 = vector.load %arg2[%c0_36, %c0_37, %c0_38] : memref<1x4x512xf32, #tpu.memory_space<vmem>>, vector<1x4x512xf32>
      %71 = vector.shape_cast %70 : vector<1x4x512xf32> to vector<4x512xf32>
      %cst_39 = arith.constant 0.000000e+00 : f32
      %72 = vector.shape_cast %69 : vector<1x512xi1> to vector<1x512xi1>
      %73 = vector.broadcast %72 : vector<1x512xi1> to vector<4x512xi1>
      %74 = vector.broadcast %cst_39 : f32 to vector<4x512xf32>
      %75 = arith.select %73, %71, %74 : vector<4x512xi1>, vector<4x512xf32>
      %76 = arith.truncf %75 : vector<4x512xf32> to vector<4x512xbf16>
      %c0_40 = arith.constant 0 : index
      %c128_41 = arith.constant 128 : index
      %77 = vector.load %arg8[%c0_40, %c128_41] : memref<4x768xbf16, #tpu.memory_space<vmem>>, vector<4x512xbf16>
      tpu.vector_store %arg8[%c0_40, %c128_41], %76 {strides = array<i32>} : memref<4x768xbf16, #tpu.memory_space<vmem>>, vector<4x512xbf16>,
    } else {
    }
    %28 = tpu.iota {dimensions = array<i32: 1>} : vector<1x128xi32>
    %29 = vector.broadcast %1 : i32 to vector<1x128xi32>
    %30 = arith.addi %28, %29 : vector<1x128xi32>
    %c640_i32 = arith.constant 640 : i32
    %31 = vector.broadcast %c640_i32 : i32 to vector<1x128xi32>
    %32 = arith.addi %30, %31 : vector<1x128xi32>
    %c16_i32_10 = arith.constant 16 : i32
    %33 = vector.broadcast %c16_i32_10 : i32 to vector<1x128xi32>
    %34 = arith.cmpi slt, %32, %33 : vector<1x128xi32>
    %c0_11 = arith.constant 0 : index
    %c0_12 = arith.constant 0 : index
    %c0_13 = arith.constant 0 : index
    %35 = vector.load %arg4[%c0_11, %c0_12, %c0_13] : memref<1x4x128xf32, #tpu.memory_space<vmem>>, vector<1x4x128xf32>
    %36 = vector.shape_cast %35 : vector<1x4x128xf32> to vector<4x128xf32>
    %cst_14 = arith.constant 0.000000e+00 : f32
    %37 = vector.shape_cast %34 : vector<1x128xi1> to vector<1x128xi1>
    %38 = vector.broadcast %37 : vector<1x128xi1> to vector<4x128xi1>
    %39 = vector.broadcast %cst_14 : f32 to vector<4x128xf32>
    %40 = arith.select %38, %36, %39 : vector<4x128xi1>, vector<4x128xf32>
    %41 = arith.truncf %40 : vector<4x128xf32> to vector<4x128xbf16>
    %c0_15 = arith.constant 0 : index
    %c640 = arith.constant 640 : index
    %42 = vector.load %arg8[%c0_15, %c640] : memref<4x768xbf16, #tpu.memory_space<vmem>>, vector<4x128xbf16>
    tpu.vector_store %arg8[%c0_15, %c640], %41 {strides = array<i32>} : memref<4x768xbf16, #tpu.memory_space<vmem>>, vector<4x128xbf16>,
    %c0_16 = arith.constant 0 : index
    %c0_17 = arith.constant 0 : index
    %c0_18 = arith.constant 0 : index
    %43 = vector.load %arg5[%c0_16, %c0_17, %c0_18] : memref<3x8x4xbf16, #tpu.memory_space<vmem>>, vector<1x8x4xbf16>
    %44 = vector.shape_cast %43 : vector<1x8x4xbf16> to vector<8x4xbf16>
    %c0_19 = arith.constant 0 : index
    %c127 = arith.constant 127 : index
    %45 = vector.load %arg8[%c0_19, %c127] : memref<4x768xbf16, #tpu.memory_space<vmem>>, vector<4x512xbf16>
    %cst_20 = arith.constant dense<0.000000e+00> : vector<8x512xf32>
    %46 = tpu.matmul %44, %45, %cst_20 {dimension_numbers = #tpu.dot_dimension_numbers<[1], [0], [0], [1], [0, 0, 1, 1], [], []>} : vector<8x4xbf16>, vector<4x512xbf16>, vector<8x512xf32> -> vector<8x512xf32>
    %c1 = arith.constant 1 : index
    %c0_21 = arith.constant 0 : index
    %c0_22 = arith.constant 0 : index
    %47 = vector.load %arg5[%c1, %c0_21, %c0_22] : memref<3x8x4xbf16, #tpu.memory_space<vmem>>, vector<1x8x4xbf16>
    %48 = vector.shape_cast %47 : vector<1x8x4xbf16> to vector<8x4xbf16>
    %c0_23 = arith.constant 0 : index
    %c128 = arith.constant 128 : index
    %49 = vector.load %arg8[%c0_23, %c128] : memref<4x768xbf16, #tpu.memory_space<vmem>>, vector<4x512xbf16>
    %cst_24 = arith.constant dense<0.000000e+00> : vector<8x512xf32>
    %50 = tpu.matmul %48, %49, %cst_24 {dimension_numbers = #tpu.dot_dimension_numbers<[1], [0], [0], [1], [0, 0, 1, 1], [], []>} : vector<8x4xbf16>, vector<4x512xbf16>, vector<8x512xf32> -> vector<8x512xf32>
    %51 = arith.addf %46, %50 : vector<8x512xf32>
    %c2 = arith.constant 2 : index
    %c0_25 = arith.constant 0 : index
    %c0_26 = arith.constant 0 : index
    %52 = vector.load %arg5[%c2, %c0_25, %c0_26] : memref<3x8x4xbf16, #tpu.memory_space<vmem>>, vector<1x8x4xbf16>
    %53 = vector.shape_cast %52 : vector<1x8x4xbf16> to vector<8x4xbf16>
    %c0_27 = arith.constant 0 : index
    %c129 = arith.constant 129 : index
    %54 = vector.load %arg8[%c0_27, %c129] : memref<4x768xbf16, #tpu.memory_space<vmem>>, vector<4x512xbf16>
    %cst_28 = arith.constant dense<0.000000e+00> : vector<8x512xf32>
    %55 = tpu.matmul %53, %54, %cst_28 {dimension_numbers = #tpu.dot_dimension_numbers<[1], [0], [0], [1], [0, 0, 1, 1], [], []>} : vector<8x4xbf16>, vector<4x512xbf16>, vector<8x512xf32> -> vector<8x512xf32>
    %56 = arith.addf %51, %55 : vector<8x512xf32>
    %c0_29 = arith.constant 0 : index
    %c0_30 = arith.constant 0 : index
    %57 = vector.load %arg6[%c0_29, %c0_30] : memref<8x1xf32, #tpu.memory_space<vmem>>, vector<8x1xf32>
    %58 = vector.broadcast %57 : vector<8x1xf32> to vector<8x512xf32>
    %59 = arith.addf %56, %58 : vector<8x512xf32>
    %c0_31 = arith.constant 0 : index
    %c0_32 = arith.constant 0 : index
    %c0_33 = arith.constant 0 : index
    %60 = vector.load %arg7[%c0_31, %c0_32, %c0_33] : memref<1x8x512xf32, #tpu.memory_space<vmem>>, vector<1x8x512xf32>
    %61 = vector.shape_cast %60 : vector<1x8x512xf32> to vector<8x512xf32>
    %62 = vector.shape_cast %59 : vector<8x512xf32> to vector<1x8x512xf32>
    tpu.vector_store %arg7[%c0_31, %c0_32, %c0_33], %62 {strides = array<i32>} : memref<1x8x512xf32, #tpu.memory_space<vmem>>, vector<1x8x512xf32>,
    return
  }
  func.func @transform_0(%arg0: i32, %arg1: i32) -> (i32, i32, i32) {
    %c0_i32 = arith.constant 0 : i32
    %0 = arith.minsi %arg1, %c0_i32 : i32
    %c0_i32_0 = arith.constant 0 : i32
    %c0_i32_1 = arith.constant 0 : i32
    return %arg0, %c0_i32_0, %0 : i32, i32, i32
  }
  func.func @transform_1(%arg0: i32, %arg1: i32) -> (i32, i32, i32) {
    %c4_i32 = arith.constant 4 : i32
    %0 = arith.muli %arg1, %c4_i32 : i32
    %c1_i32 = arith.constant 1 : i32
    %1 = arith.subi %0, %c1_i32 : i32
    %c3_i32 = arith.constant 3 : i32
    %2 = arith.minsi %1, %c3_i32 : i32
    %c0_i32 = arith.constant 0 : i32
    %3 = arith.maxsi %2, %c0_i32 : i32
    %c0_i32_0 = arith.constant 0 : i32
    %c0_i32_1 = arith.constant 0 : i32
    return %arg0, %c0_i32_0, %3 : i32, i32, i32
  }
  func.func @transform_2(%arg0: i32, %arg1: i32) -> (i32, i32, i32) {
    %c1_i32 = arith.constant 1 : i32
    %0 = arith.addi %arg1, %c1_i32 : i32
    %c4_i32 = arith.constant 4 : i32
    %1 = arith.muli %0, %c4_i32 : i32
    %c3_i32 = arith.constant 3 : i32
    %2 = arith.minsi %1, %c3_i32 : i32
    %c0_i32 = arith.constant 0 : i32
    %c0_i32_0 = arith.constant 0 : i32
    return %arg0, %c0_i32, %2 : i32, i32, i32
  }
  func.func @transform_3(%arg0: i32, %arg1: i32) -> (i32, i32, i32) {
    %c0_i32 = arith.constant 0 : i32
    %c0_i32_0 = arith.constant 0 : i32
    %c0_i32_1 = arith.constant 0 : i32
    %c0_i32_2 = arith.constant 0 : i32
    return %c0_i32, %c0_i32_0, %c0_i32_1 : i32, i32, i32
  }
  func.func @transform_4(%arg0: i32, %arg1: i32) -> (i32, i32) {
    %c0_i32 = arith.constant 0 : i32
    %c0_i32_0 = arith.constant 0 : i32
    %c0_i32_1 = arith.constant 0 : i32
    return %c0_i32, %c0_i32_0 : i32, i32
  }
  func.func @transform_5(%arg0: i32, %arg1: i32) -> (i32, i32, i32) {
    %c0_i32 = arith.constant 0 : i32
    %c0_i32_0 = arith.constant 0 : i32
    return %arg0, %c0_i32, %arg1 : i32, i32, i32
  }
}

</mosaic_0001>

<bundles_post_ra>
// kernel: tpu_custom_call.1
= control target key start
LH: loop header
LB: loop body
LE: loop exit
PB: predicated region body
PF: predicated region fallthrough
CT: control target
= control target key end

     0   :  { %s1670_s0 = inlined_call_operand.hbm [shape: f32[2,4,512], index: 0, kind: input, shape index: {}]   ;;  %s1671_s1 = inlined_call_operand.hbm [shape: f32[2,4,512], index: 1, kind: input, shape index: {}]   ;;  %s1672_s2 = inlined_call_operand.hbm [shape: f32[2,4,512], index: 2, kind: input, shape index: {}]   ;;  %s1673_s3 = inlined_call_operand.vmem [shape: bf16[3,8,4], index: 3, kind: input, shape index: {}]   ;;  %s1674_s4 = inlined_call_operand.vmem [shape: f32[8,1], index: 4, kind: input, shape index: {}]   ;;  %s1675_s5 = inlined_call_operand.hbm [shape: f32[2,8,512], index: 5, kind: output, shape index: {}]  }
   0x1   :  { %1682 = sst [smem:[#allocation18_spill]] %s1671_s1 }
   0x2   :  { %10 = vsyncpa [#allocation4], 0 }
   0x3   :  { %12 = vsyncpa [#allocation4 + $0x1], 0 }
   0x4   :  { %13 = vsyncpa [#allocation7], 0 }
   0x5   :  { %15 = vsyncpa [#allocation7 + $0x1], 0 }
   0x6   :  { %16 = vsyncpa [#allocation5], 0 }
   0x7   :  { %18 = vsyncpa [#allocation5 + $0x1], 0  ;;  %s1423_s18 = smov 0   ;;  %s1425_s19 = smov 0  }
   0x8   :  { %s1427_s20 = smov 0   ;;  %s1429_s21 = smov 0  }
   0x9   :  { %s1431_s22 = smov 0   ;;  %s1433_s23 = smov 0  }
   0xa LB: > { %1683 = sst [smem:[#allocation13_spill]] %s1370_s20  ;;  %s1454_s24 = sadd.s32 4294967295, %s1382_s23   ;;  %s1382_s23 = sphi %s1433_s23, %s24_s23   ;;  %s1378_s22 = sphi %s1431_s22, %s1701_s22   ;;  %s1374_s21 = sphi %s1429_s21, %s1700_s21   ;;  %s1370_s20 = sphi %s1427_s20, %s1699_s20   ;;  %s1366_s19 = sphi %s1425_s19, %s1703_s19   ;;  %s1362_s18 = sphi %s1423_s18, %s1702_s18  }
   0xb   : > { %1684 = sst [smem:[#allocation14_spill]] %s1378_s22  ;;  %s1088_s25 = sadd.s32 4294967294, %s1382_s23  }
   0xc   : > { %1685 = sst [smem:[#allocation15_spill]] %s1382_s23  ;;  %s36_s26 = sadd.s32 1, %s1378_s22 }
   0xd   : > { %s49_s27 = sadd.s32 1, %s1370_s20  ;;  %p38_p0 = scmp.ge.s32.totalorder %s36_s26, 2 }
   0xe   : > { %p56_p1 = scmp.ne.s32.totalorder %s1370_s20, %s1366_s19  ;;  %p57_p2 = scmp.eq.s32.totalorder %s1382_s23, 0 }
   0xf   : > { %p62_p3 = scmp.ne.s32.totalorder %s1366_s19, %s1362_s18  ;;  %s1705_s26 = smov (%p38_p0, %s36_s26), 0 }
  0x10   : > { %1686 = sst [smem:[#allocation16_spill]] %s1705_s26  ;;  %p1466_p4 = por %p57_p2, %p56_p1 }
  0x11   : > { %p63_p5 = scmp.eq.s32.totalorder %s1454_s24, 0  ;;  %s44_s29 = ssub.s32 %s1378_s22, %s1705_s26 }
  0x12   : > { %p206_p6 = scmp.eq.s32.totalorder %s1454_s24, 1  ;;  %p47_p7 = scmp.eq.s32.totalorder %s44_s29, 0 }
  0x13   : > { %p1474_p8 = por %p63_p5, %p62_p3  ;;  %p212_p10 = scmp.eq.s32.totalorder %s1088_s25, 1 }
  0x14   : > { %p1478_p9 = por %p206_p6, %p56_p1  ;;  %p1156_p13 = scmp.lt.s32.totalorder %s1382_s23, 2 }
  0x15   : > { %s1483_s7 = scalar_select %p47_p7, %s1370_s20, %s49_s27  }
  0x16   : > { %p1485_p11 = por %p212_p10, %p62_p3  ;;  %s1492_s9 = sand.u32 1, %s1370_s20  }
  0x17   : > { %1690 = sst [smem:[#allocation17_spill]] %s1483_s7  ;;  %s1495_s10 = sshll.u32 %s1378_s22, 8 }
  0x18   : > { %s261_s11 = sand.u32 1, %s1382_s23   ;;  %p1500_p0 = pnand %p1156_p13, %p1466_p4 }
  0x19   : > { %s1677_s13 = sshll.u32 %s1492_s9, 2  ;;  %s1693_s1 = sld [smem:[#allocation18_spill]] }
  0x1a   : > { %s265_s17 = scalar_lea.vmem [#allocation6], %s1677_s13  ;;  %p1100_p1 = scmp.ge.s32.totalorder %s1382_s23, 1 }
  0x1b   : > { %s280_s25 = sshll.u32 %s265_s17, 4  ;;  %s1512_s27 = scalar_lea.sflag [#allocation7], %s261_s11  ;;  %s281_s25 = int_to_ptr.vmem [resolvable:$true] %s280_s25 }
  0x1c   : > { %p1216_p2 = pneg %p1500_p0  ;;  %s1227_s28 = scalar_lea.vmem %s281_s25, 64 }
  0x1d   : > { %p1228_p3 = scmp.ne.s32.totalorder %s281_s25, %s1227_s28  ;;  %s1384_s29 = smov [#allocation6]  }
  0x1e   : > { %s1232_s26 = sshll.u32 %s1384_s29, 4  ;;  %s1233_s26 = int_to_ptr.vmem [resolvable:$false] %s1232_s26 }
  0x1f   : > { %s278_s16 = scalar_lea.hbm %s1693_s1, %s1495_s10  ;;  %p1230_p4 = pnand %p1228_p3, %p1216_p2 }
  0x20   : > { %s1234_s14 = scalar_lea.vmem %s1233_s26, 128  ;;  %p1235_p6 = scmp.lt.s32.totalorder %s281_s25, %s1233_s26 }
  0x21   : > { %p1231_p5 = pneg %p1230_p4  ;;  %p1236_p7 = scmp.lt.s32.totalorder %s1234_s14, %s1227_s28 }
  0x23   : > { %p1237_p10 = por %p1236_p7, %p1235_p6 }
  0x25   : > { %p1238_p13 = pnand %p1237_p10, %p1231_p5 }
  0x27   : > { %1241 = shalt.err (!%p1238_p13)
}
  0x28   : > { %1148 = dma.hbm_to_vmem [thread:$0]  (!%p1500_p0), %s278_s16, 64, %s281_s25, %s1512_s27  }
  0x29   : > { %p309_p3 = scmp.lt.s32.totalorder %s1382_s23, 3  ;;  %s1091_s26 = sshll.u32 %s1492_s9, 4 }
  0x2a   : > { %s252_s28 = scalar_lea.hbm %s1670_s0, %s1495_s10  ;;  %s242_s29 = scalar_lea.vmem [#allocation3], %s1091_s26 }
  0x2b   : > { %p1525_p4 = pnand %p1100_p1, %p309_p3  ;;  %s254_s14 = sshll.u32 %s242_s29, 4  ;;  %s255_s14 = int_to_ptr.vmem [resolvable:$true] %s254_s14 }
  0x2c   : > { %s1131_s13 = sadd.s32 192, %s1495_s10  ;;  %s239_s16 = scalar_lea.sflag [#allocation4], %s1492_s9 }
  0x2d   : > { %s1538_s7 = scalar_lea.hbm %s1672_s2, %s1131_s13  ;;  %s1255_s25 = scalar_lea.vmem %s255_s14, 256 }
  0x2e   : > { %p1256_p1 = scmp.ne.s32.totalorder %s255_s14, %s1255_s25  ;;  %s1385_s20 = smov [#allocation3]  }
  0x2f   : > { %s1260_s23 = sshll.u32 %s1385_s20, 4  ;;  %s1261_s23 = int_to_ptr.vmem [resolvable:$false] %s1260_s23 }
  0x30   : > { %p1258_p5 = pnand %p1256_p1, %p1216_p2  ;;  %s1262_s15 = scalar_lea.vmem %s1261_s23, 512 }
  0x31   : > { %p1263_p7 = scmp.lt.s32.totalorder %s255_s14, %s1261_s23  ;;  %p1264_p10 = scmp.lt.s32.totalorder %s1262_s15, %s1255_s25 }
  0x32   : > { %p1259_p6 = pneg %p1258_p5 }
  0x33   : > { %p1265_p13 = por %p1264_p10, %p1263_p7 }
  0x35   : > { %p1266_p3 = pnand %p1265_p13, %p1259_p6 }
  0x37   : > { %1269 = shalt.err (!%p1266_p3)
}
  0x38   : > { %1145 = dma.hbm_to_vmem [thread:$0]  (!%p1500_p0), %s252_s28, 256, %s255_s14, %s239_s16  }
  0x39   : > { %s1695_s1 = sshll.u32 %s1492_s9, 2  ;;  %s1386_s20 = smov [#allocation8]  }
  0x3a   : > { %s291_s22 = scalar_lea.vmem [#allocation8], %s1695_s1  ;;  %s1288_s23 = sshll.u32 %s1386_s20, 4  ;;  %s1289_s23 = int_to_ptr.vmem [resolvable:$false] %s1288_s23 }
  0x3b   : > { %s304_s10 = sshll.u32 %s291_s22, 4  ;;  %s1290_s26 = scalar_lea.vmem %s1289_s23, 128  ;;  %s305_s10 = int_to_ptr.vmem [resolvable:$true] %s304_s10 }
  0x3c   : > { %s1283_s13 = scalar_lea.vmem %s305_s10, 64  ;;  %p1291_p6 = scmp.lt.s32.totalorder %s305_s10, %s1289_s23 }
  0x3d   : > { %p1284_p1 = scmp.ne.s32.totalorder %s305_s10, %s1283_s13  ;;  %p1292_p7 = scmp.lt.s32.totalorder %s1290_s26, %s1283_s13 }
  0x3f   : > { %p1286_p5 = pnand %p1284_p1, %p1216_p2  ;;  %p1293_p10 = por %p1292_p7, %p1291_p6 }
  0x41   : > { %p1287_p12 = pneg %p1286_p5 }
  0x43   : > { %p1294_p13 = pnand %p1293_p10, %p1287_p12 }
  0x45   : > { %1297 = shalt.err (!%p1294_p13)
}
  0x46   : > { %1151 = dma.hbm_to_vmem [thread:$0]  (!%p1500_p0), %s1538_s7, 64, %s305_s10, %s1512_s27  }
  0x47   : > { %313 = sbr.rel (%p1525_p4) target bundleno = 454 (0x1c6), region = 40  ;;  %s1558_s9 = sand.u32 (!%p1525_p4), 1, %s1366_s19  }
  0x48   : > { %s1101_s17 = sshll.u32 (!%p1525_p4), %s1558_s9, 4  ;;  %s316_s28 = scalar_lea.sflag (!%p1525_p4), [#allocation4], %s1558_s9 }
  0x49   : > { %s319_s29 = scalar_lea.vmem (!%p1525_p4), [#allocation3], %s1101_s17 }
  0x4c   : > { %1349 = dma.done.wait (%p1474_p8), %s316_s28, 256  }
  0x4d   : > { %1351 = vsyncadd (%p1474_p8), %s316_s28, 4294967040  ;;  %s324_s7 = sand.u32 1, %s1454_s24  }
  0x4e   : > { %s325_s12 = scalar_lea.sflag [#allocation7], %s324_s7 }
  0x4f   : > { %1353 = dma.done.wait (%p1474_p8), %s325_s12, 128  }
  0x50   : > { %1355 = vsyncadd (%p1474_p8), %s325_s12, 4294967168  ;;  %v391_v0 = vlaneseq  ;;  %v1387_v1 = vmov 1983009808   ;;  %v1388_v3 = vmov 0.0|0.0   ;;  %v463_v9 = vld [vmem:[%s319_s29] sm:$0xff]  ;;  %v1389_v14 = vmov 0  }
  0x51   : > { %v494_v2 = vunpack.c.l.s4 %v1387_v1  ;;  %403 = vst [vmem:[#allocation2] sm:$0x3] %v1388_v3  ;;  %517 = vst [vmem:[#allocation2 + $0xa] sm:$0x3] %v1388_v3  ;;  %v492_v10 = vcombine.low %v1388_v3, %v1388_v3  ;;  %591 = vmatprep.mubr.bf16.mxu0 %v1389_v14  ;;  %632 = vmatprep.mubr.bf16.mxu1 %v1389_v14  ;;  %vm546_vm1 = vcmask 1041408   ;;  %s1390_s24 = smov 127  }
  0x52   : > { %v392_v4 = vand.u32 127, %v391_v0  ;;  %v497_v7 = vshrl.u32 %v391_v0, 7  ;;  %1211 = vset.pattern.permute.xlu0 %v1389_v14  ;;  %v1107_v26 = vld [vmem:[%s1673_s3 + $0x4] sm:$0xf]  ;;  %vm542_vm2 = vcmask 31744   ;;  %s1391_s11 = smov 1  }
  0x53   : > { %v495_v6 = vunpack.c.0.s8 %v494_v2  ;;  %v925_v35 = vld [vmem:[%s1674_s4] sm:$0xff]  ;;  %vm677_vm3 = vcmask 7168   ;;  %vm819_vm4 = vcmask 1039360   ;;  %v1117_v59 = vld [vmem:[%s1673_s3 + $0x8] sm:$0xf]  ;;  %s1104_s10 = sshll.u32 %s1558_s9, 5 }
  0x54   : > { %v394_v5 = vadd.s32 4294967168, %v392_v4  ;;  %v518_v48 = vld [vmem:[%s1673_s3] sm:$0xf]  ;;  %s1132_s13 = sshll.u32 %s1374_s21, 9  ;;  %s373_s20 = scalar_lea.vmem [#allocation9], %s1104_s10 }
  0x55   : > { %v498_v11 = vsub.s32 %v495_v6, %v497_v7  ;;  %s956_s23 = sshll.u32 %s373_s20, 4  ;;  %s1622_s28 = scalar_lea.hbm %s1675_s5, %s1132_s13  ;;  %s1624_s23 = int_to_ptr.vmem [resolvable:$true] %s956_s23 }
  0x56   : > { %v455_v8 = vadd.s32 128, %v394_v5  ;;  %s940_s21 = scalar_lea.sflag [#allocation5], %s1558_s9  ;;  %s1298_s29 = scalar_lea.vmem %s1624_s23, 512 }
  0x57   : > { %v506_v16 = vrot.slane %v492_v10, %v498_v11  ;;  %p1299_p8 = scmp.ne.s32.totalorder %s1624_s23, %s1298_s29  ;;  %s1392_s7 = smov [#allocation9]  }
  0x58   : > { %vm459_vm0 = vcmp.lt.s32.totalorder %v455_v8, 16  ;;  %v1118_v34 = vld.sshfl [vmem:[#allocation2 + $0xa] sm:$0x3 pattern:$0x76325410]  ;;  %s1302_s12 = sshll.u32 %s1392_s7, 4  ;;  %s1303_s12 = int_to_ptr.vmem [resolvable:$false] %s1302_s12 }
  0x59   : > { %v479_v12 = vsel %vm459_vm0, %v463_v9, 0.0  ;;  %v1213_v20 = vcombine.low %v506_v16, %v506_v16  ;;  %p1300_p12 = pnand %p1299_p8, %p1478_p9  ;;  %p1305_p2 = scmp.lt.s32.totalorder %s1624_s23, %s1303_s12 }
  0x5a   : > { %v483_v13 = vpack.c.bf16 %v479_v12, %v479_v12 }
  0x5b   : > { %v799_v22 = vrot.slane %v1213_v20, %v498_v11  ;;  %p1301_p0 = pneg %p1300_p12 }
  0x5c   : > { %v491_v15 = vcombine.low %v483_v13, %v1388_v3 }
  0x5d   : > { %v801_v24 = vcombine.high %v799_v22, %v799_v22  ;;  %v554_v25 = vsel %vm546_vm1, %v799_v22, 0 }
  0x5e   : > { %v499_v17 = vrot.slane %v491_v15, %v498_v11 }
  0x5f   : > { %1110 = vmatprep.subr.msk.bf16.mxu1 %vm546_vm1, %v801_v24 }
  0x60   : > { %v507_v18 = vcombine.low %v499_v17, %v506_v16  ;;  %615 = vmatpush1.bf16.msra.mxu1 %v554_v25 }
  0x62   : > { %509 = vst [vmem:[#allocation2 + $0x2] sm:$0xff] %v507_v18  ;;  %v792_v19 = vrot.slane %v507_v18, %v498_v11 }
  0x63   : > { %1111 = vmatmul.mubr.msk.bf16.vlgmr.msra.gmra.mxu1 %vm542_vm2, %v1107_v26 }
  0x64   : > { %809 = vrot.lane.b32.xlu1 %v792_v19, %s1390_s24  ;;  %v800_v21 = vcombine.high %v792_v19, %v792_v19  ;;  %v548_v23 = vsel %vm546_vm1, %v792_v19, 0  ;;  %770 = vmatprep.mubr.bf16.mxu1 %v1389_v14 }
  0x66   : > { %1108 = vmatprep.subr.msk.bf16.mxu0 %vm546_vm1, %v800_v21 }
  0x67   : > { %574 = vmatpush1.bf16.msra.mxu0 %v548_v23 }
  0x69   : > { %v1112_v27 = vld.sshfl [vmem:[#allocation2 + $0x8] sm:$0x3 pattern:$0x76325410]  ;;  %v519_v28 = vld [vmem:[#allocation2] sm:$0xff] }
  0x6a   : > { %675 = vrot.lane.b32.xlu0 %v1112_v27, %s1391_s11  ;;  %v650_v29 = vrot.slane %v519_v28, %v498_v11  ;;  %v643_v30 = vcombine.high %v519_v28, %v519_v28  ;;  %1109 = vmatmul.mubr.msk.bf16.vlgmr.msra.gmra.mxu0 %vm542_vm2, %v1107_v26 }
  0x6b   : > { %729 = vmatprep.mubr.bf16.mxu0 %v1389_v14 }
  0x6c   : > { %v657_v31 = vrot.slane %v643_v30, %v498_v11  ;;  %v658_v32 = vcombine.high %v650_v29, %v650_v29 }
  0x6e   : > { %667 = vrot.lane.b32.xlu0 %v650_v29, %s1391_s11  ;;  %671 = vrot.lane.b32.xlu1 %v657_v31, %s1391_s11  ;;  %v659_v33 = vcombine.high %v657_v31, %v657_v31 }
  0x72   : > { %669 = vrot.lane.b32.xlu0 %v658_v32, %s1391_s11  ;;  %673 = vrot.lane.b32.xlu1 %v659_v33, %s1391_s11 }
  0x76   : > { %811 = vrot.lane.b32.xlu0 %v800_v21, %s1390_s24  ;;  %813 = vrot.lane.b32.xlu1 %v799_v22, %s1390_s24 }
  0x7a   : > { %815 = vrot.lane.b32.xlu0 %v801_v24, %s1390_s24  ;;  %817 = vrot.lane.b32.xlu1 %v1118_v34, %s1390_s24  ;;  %s1304_s24 = scalar_lea.vmem %s1303_s12, 1024 }
  0x7b   : > { %p1306_p4 = scmp.lt.s32.totalorder %s1304_s24, %s1298_s29 }
  0x7d   : > { %p1307_p3 = por %p1306_p4, %p1305_p2 }
  0x7e   : > { %928 = vperm.xlu0 %1211, %v925_v35  }
  0x7f   : > { %p1308_p1 = pnand %p1307_p3, %p1301_p0 }
  0xd6   : > { %v810_v36 = vpop.permute.xlu1 %809 }
  0xdc   : > { %v676_v37 = vpop.permute.xlu0 %675 }
  0xe0   : > { %v668_v38 = vpop.permute.xlu0 %667  ;;  %v672_v39 = vpop.permute.xlu1 %671 }
  0xe4   : > { %v670_v40 = vpop.permute.xlu0 %669  ;;  %v674_v41 = vpop.permute.xlu1 %673 }
  0xe5   : > { %v678_v42 = vsel %vm677_vm3, %v668_v38, %v670_v40  ;;  %v679_v43 = vsel %vm677_vm3, %v670_v40, %v672_v39  ;;  %v680_v44 = vsel %vm677_vm3, %v672_v39, %v674_v41  ;;  %v681_v45 = vsel %vm677_vm3, %v674_v41, %v676_v37 }
  0xe6   : > { %v686_v46 = vsel %vm546_vm1, %v678_v42, 0  ;;  %1113 = vmatprep.subr.msk.bf16.mxu0 %vm546_vm1, %v679_v43  ;;  %v692_v47 = vsel %vm546_vm1, %v680_v44, 0  ;;  %1115 = vmatprep.subr.msk.bf16.mxu1 %vm546_vm1, %v681_v45 }
  0xe7   : > { %712 = vmatpush1.bf16.msra.mxu0 %v686_v46  ;;  %753 = vmatpush1.bf16.msra.mxu1 %v692_v47 }
  0xe8   : > { %v812_v49 = vpop.permute.xlu0 %811  ;;  %v814_v50 = vpop.permute.xlu1 %813 }
  0xe9   : > { %v820_v51 = vsel %vm819_vm4, %v810_v36, %v812_v49  ;;  %v821_v52 = vsel %vm819_vm4, %v812_v49, %v814_v50 }
  0xea   : > { %v828_v53 = vsel %vm546_vm1, %v820_v51, 0  ;;  %1114 = vmatmul.mubr.msk.bf16.vlgmr.msra.gmra.mxu0 %vm542_vm2, %v518_v48  ;;  %1116 = vmatmul.mubr.msk.bf16.vlgmr.msra.gmra.mxu1 %vm542_vm2, %v518_v48 }
  0xeb   : > { %1119 = vmatprep.subr.msk.bf16.mxu0 %vm546_vm1, %v821_v52  ;;  %871 = vmatprep.mubr.bf16.mxu0 %v1389_v14 }
  0xec   : > { %v816_v54 = vpop.permute.xlu0 %815  ;;  %854 = vmatpush1.bf16.msra.mxu0 %v828_v53  ;;  %v818_v55 = vpop.permute.xlu1 %817  ;;  %912 = vmatprep.mubr.bf16.mxu1 %v1389_v14 }
  0xed   : > { %v822_v56 = vsel %vm819_vm4, %v814_v50, %v816_v54  ;;  %v823_v57 = vsel %vm819_vm4, %v816_v54, %v818_v55 }
  0xee   : > { %v834_v58 = vsel %vm546_vm1, %v822_v56, 0  ;;  %1121 = vmatprep.subr.msk.bf16.mxu1 %vm546_vm1, %v823_v57 }
  0xef   : > { %895 = vmatpush1.bf16.msra.mxu1 %v834_v58 }
  0xf2   : > { %1120 = vmatmul.mubr.msk.bf16.vlgmr.msra.gmra.mxu0 %vm542_vm2, %v1117_v59  ;;  %1122 = vmatmul.mubr.msk.bf16.vlgmr.msra.gmra.mxu1 %vm542_vm2, %v1117_v59 }
  0xf9   : > { %v929_v14 = vpop.permute.xlu0 %928 }
 0x123   : > { %v634_v61 = vpop.f32.mrf.mxu1 }
 0x125   : > { %v636_v63 = vpop.f32.mrf.mxu1 }
 0x127   : > { %v638_v1 = vpop.f32.mrf.mxu1 }
 0x129   : > { %v639_v3 = vpop.f32.mrf.mxu1 }
 0x12a   : > { %v593_v60 = vpop.f32.mrf.mxu0 }
 0x12c   : > { %v595_v62 = vpop.f32.mrf.mxu0 }
 0x12e   : > { %v597_v0 = vpop.f32.mrf.mxu0 }
 0x130   : > { %v598_v2 = vpop.f32.mrf.mxu0 }
 0x1aa   : > { %v731_v4 = vpop.f32.mrf.mxu0  ;;  %v772_v5 = vpop.f32.mrf.mxu1 }
 0x1ab   : > { %v732_v12 = vadd.f32 %v731_v4, %v593_v60  ;;  %v773_v13 = vadd.f32 %v772_v5, %v634_v61 }
 0x1ac   : > { %v733_v6 = vpop.f32.mrf.mxu0  ;;  %v774_v7 = vpop.f32.mrf.mxu1 }
 0x1ad   : > { %v734_v17 = vadd.f32 %v733_v6, %v595_v62  ;;  %v775_v18 = vadd.f32 %v774_v7, %v636_v63 }
 0x1ae   : > { %v735_v8 = vpop.f32.mrf.mxu0  ;;  %v776_v9 = vpop.f32.mrf.mxu1 }
 0x1b0   : > { %v736_v10 = vpop.f32.mrf.mxu0  ;;  %v777_v11 = vpop.f32.mrf.mxu1 }
 0x1b2   : > { %v873_v15 = vpop.f32.mrf.mxu0  ;;  %v914_v16 = vpop.f32.mrf.mxu1 }
 0x1b3   : > { %v921_v19 = vadd.f32 %v873_v15, %v732_v12  ;;  %v923_v20 = vadd.f32 %v914_v16, %v773_v13 }
 0x1b4   : > { %v875_v21 = vpop.f32.mrf.mxu0  ;;  %v916_v22 = vpop.f32.mrf.mxu1 }
 0x1b5   : > { %v931_v23 = vadd.f32 %v929_v14, %v921_v19  ;;  %v922_v24 = vadd.f32 %v875_v21, %v734_v17  ;;  %v933_v25 = vadd.f32 %v929_v14, %v923_v20  ;;  %v924_v26 = vadd.f32 %v916_v22, %v775_v18 }
 0x1b6   : > { %v877_v27 = vpop.f32.mrf.mxu0  ;;  %v918_v28 = vpop.f32.mrf.mxu1 }
 0x1b7   : > { %935 = vst [vmem:[%s373_s20] sm:$0xff] %v931_v23  ;;  %v932_v29 = vadd.f32 %v929_v14, %v922_v24  ;;  %937 = vst [vmem:[%s373_s20 + $0x10] sm:$0xff] %v933_v25  ;;  %v934_v30 = vadd.f32 %v929_v14, %v924_v26 }
 0x1b8   : > { %v878_v31 = vpop.f32.mrf.mxu0  ;;  %v919_v32 = vpop.f32.mrf.mxu1 }
 0x1b9   : > { %936 = vst [vmem:[%s373_s20 + $0x8] sm:$0xff] %v932_v29  ;;  %938 = vst [vmem:[%s373_s20 + $0x18] sm:$0xff] %v934_v30 }
 0x1ba   : > { %1311 = shalt.err (!%p1308_p1)
}
 0x1bb   : > { %s1312_s30 = scalar_lea.hbm %s1622_s28, 512  ;;  %s1316_s11 = scalar_lea.hbm %s1675_s5, 1024 }
 0x1bc   : > { %p1313_p5 = scmp.ne.s32.totalorder %s1622_s28, %s1312_s30  ;;  %p1317_p10 = scmp.lt.s32.totalorder %s1622_s28, %s1675_s5 }
 0x1bd   : > { %p1318_p13 = scmp.lt.s32.totalorder %s1316_s11, %s1312_s30 }
 0x1be   : > { %p1314_p6 = pnand %p1313_p5, %p1478_p9 }
 0x1bf   : > { %p1319_p8 = por %p1318_p13, %p1317_p10 }
 0x1c0   : > { %p1315_p7 = pneg %p1314_p6 }
 0x1c2   : > { %p1320_p12 = pnand %p1319_p8, %p1315_p7 }
 0x1c4   : > { %1323 = shalt.err (!%p1320_p12)
}
 0x1c5   : > { %1140 = dma.vmem_to_hbm [thread:$0]  (%p1478_p9), %s1624_s23, 512, %s1622_s28, %s940_s21  }
 0x1c6 PF: > { %s1696_s25 = sld [smem:[#allocation15_spill]]  ;;  %s968_s15 = sand.u32 1, %s1362_s18  }
 0x1c7   : > { %s969_s1 = scalar_lea.sflag [#allocation5], %s968_s15 }
 0x1cc   : > { %p1697_p0 = scmp.ge.s32.totalorder %s1696_s25, 2 }
 0x1ce   : > { %p1153_p2 = pnand %p1697_p0, %p1485_p11 }
 0x1d0   : > { %p1154_p4 = pneg %p1153_p2 }
 0x1d2   : > { %1357 = dma.done.wait (%p1154_p4), %s969_s1, 512  }
 0x1d3   : > { %1359 = vsyncadd (%p1154_p4), %s969_s1, 4294966784  ;;  %s24_s23 = sadd.s32 1, %s1696_s25   ;;  %s1698_s6 = sld [smem:[#allocation13_spill]] }
 0x1d4   : > { %p21_p3 = scmp.ge.s32.totalorder %s24_s23, 4   ;;  %s1699_s20 = sld [smem:[#allocation17_spill]] }
 0x1d5   : > { %s1700_s21 = sld [smem:[#allocation14_spill]]  ;;  %s1702_s18 = smov %s1366_s19 }
 0x1d6   : > { %s1701_s22 = sld [smem:[#allocation16_spill]]  ;;  %23 = sbr.rel (!%p21_p3) target bundleno = 10 (0xa), region = 119 }
 0x1d9   : > { %s1703_s19 = smov %s1698_s6 }
 0x1db   :  { %974 = vsyncpa [#allocation4], 1 }
 0x1dc   :  { %976 = vsyncpa [#allocation4 + $0x1], 1 }
 0x1dd   :  { %977 = vsyncpa [#allocation7], 1 }
 0x1de   :  { %979 = vsyncpa [#allocation7 + $0x1], 1 }
 0x1df   :  { %980 = vsyncpa [#allocation5], 1 }
 0x1e0   :  { %982 = vsyncpa [#allocation5 + $0x1], 1 }

</bundles_post_ra>
